<compile_context>
chip_gen: v6e
topology: v6e:2x2x1
jax: 0.10.0
libtpu: 0.0.40
codegen_flags: <defaults>
</compile_context>

<pallas_src>
import functools

import jax
import jax.numpy as jnp
import numpy as np
from jax.experimental import pallas as pl
from jax.experimental.pallas import tpu as pltpu


def _round_up(v, m):
    return ((v + m - 1) // m) * m


def _global_sa_kernel(offsets_ref, firstb_ref, lastb_ref,     # scalar prefetch (SMEM)
                      packed_ref, w1_ref, w2_ref, b2_ref,     # streamed / resident VMEM
                      out_ref,                                 # per-core resident accumulator
                      *, tile_n, tiles_per_core):
    """One point tile: fused MLP + segment max over only the batches present in the tile.

    packed_ref: [tile_n, C_in+4]  matmul dtype   ([x | pos | ones]; pad rows are zero)
    w1_ref:     [C_in+4, H]       matmul dtype   (bias1 folded into the last row)
    w2_ref:     [H, C_pad]        matmul dtype
    b2_ref:     [1, C_pad]        f32
    out_ref:    [B_pad, C_pad]    f32, resident across the inner grid axis
    offsets_ref: [B+1] int32 row offsets; firstb/lastb: [n_tiles] int32 per-tile batch range.
    """
    core = pl.program_id(0)
    step = pl.program_id(1)
    tile = core * tiles_per_core + step                  # global tile index

    # Initialize this core's resident accumulator exactly once (0.0 is exact: h >= 0).
    @pl.when(step == 0)
    def _():
        out_ref[...] = jnp.zeros_like(out_ref)

    # ---- MLP hot path: relu(relu(packed @ W1) @ W2 + b2) (MXU + VPU, f32 accumulate) ----
    h = jnp.dot(packed_ref[...], w1_ref[...], preferred_element_type=jnp.float32)
    h = jnp.maximum(h, 0.0)
    h = jnp.dot(h.astype(w2_ref.dtype), w2_ref[...],
                preferred_element_type=jnp.float32) + b2_ref[...]
    h = jnp.maximum(h, 0.0)                              # [tile_n, C_pad], all >= 0

    # ---- segment max over the (few) batches intersecting this tile (sorted batch ids) ----
    tile_start = tile * tile_n
    row_ids = tile_start + jax.lax.broadcasted_iota(jnp.int32, (tile_n, 1), 0)
    b_pad, c_pad = out_ref.shape
    out_rows = jax.lax.broadcasted_iota(jnp.int32, (b_pad, 1), 0)

    def body(b, tile_max):
        lo = offsets_ref[b]
        hi = offsets_ref[b + 1]
        mask = (row_ids >= lo) & (row_ids < hi)                           # [tile_n, 1]
        seg = jnp.max(jnp.where(mask, h, 0.0), axis=0, keepdims=True)     # [1, C_pad]
        return jnp.where(out_rows == b, jnp.maximum(tile_max, seg), tile_max)

    tile_max = jax.lax.fori_loop(firstb_ref[tile], lastb_ref[tile] + 1, body,
                                 jnp.zeros((b_pad, c_pad), jnp.float32))

    # Single dense (sublane/lane aligned) accumulate store per tile.
    out_ref[...] = jnp.maximum(out_ref[...], tile_max)


def global_sa_module(x, pos, batch, params, num_batches, *,
                     tile_n=8192, core_splits=1,
                     matmul_dtype=jnp.bfloat16,
                     vmem_limit_bytes=48 * 1024 * 1024):
    """JAX wrapper reproducing GlobalSAModule.forward.

    tile_n:         point-tile size (multiple of 128).  8192 is fine on v5e/v6e; on v7x
                    (64 MiB VMEM) prefer ~4096 with f32 operands, 8192 with bf16.
    core_splits:    set to 2 on v7x to split the point range across both TensorCores
                    (per-core partial max accumulators, combined in the wrapper).
    matmul_dtype:   bf16 (default, MXU-native on every generation) or f32; accumulation,
                    bias2, ReLU and the segment max always stay f32.
    """
    w1, b1, w2, b2 = params
    n, c_in = x.shape
    hidden = w1.shape[1]
    c_out = w2.shape[1]

    # ---- fold bias1 into W1; pad W2/b2 to a lane-dense output width ----
    c_pack = c_in + 3 + 1                                       # x | pos | ones
    w1_packed = jnp.concatenate([w1, b1.reshape(1, hidden)], axis=0).astype(matmul_dtype)
    c_pad = _round_up(c_out, 128)
    b_pad = _round_up(num_batches, 8)
    w2p = jnp.pad(w2, ((0, 0), (0, c_pad - c_out))).astype(matmul_dtype)   # [H, C_pad]
    b2p = jnp.pad(b2, ((0, 0), (0, c_pad - c_out))).astype(jnp.float32)    # [1, C_pad]

    # ---- point-axis tiling (tile_n multiple of 128, clamped for small inputs) ----
    tile_n = _round_up(max(128, min(tile_n, _round_up(n, 128))), 128)
    n_pad = _round_up(n, tile_n * core_splits)
    pad_rows = n_pad - n
    n_tiles = n_pad // tile_n
    tiles_per_core = n_tiles // core_splits

    # ---- single packed streamed input: [x | pos | 1.0], zero-padded rows ----
    packed = jnp.concatenate(
        [x.astype(matmul_dtype), pos.astype(matmul_dtype),
         jnp.ones((n, 1), matmul_dtype)], axis=1)               # [N, C_pack]
    packed = jnp.pad(packed, ((0, pad_rows), (0, 0)))           # pad rows never selected

    # ---- sorted-batch bookkeeping (PyG convention: batch ids ascending) ----
    batch_i32 = batch.astype(jnp.int32)
    offsets = jnp.searchsorted(
        batch_i32, jnp.arange(num_batches + 1, dtype=jnp.int32)).astype(jnp.int32)  # [B+1]
    starts, ends = offsets[:-1], offsets[1:]
    tile_starts = jnp.arange(n_tiles, dtype=jnp.int32) * tile_n
    tile_ends = tile_starts + tile_n
    first_b = jnp.searchsorted(ends, tile_starts, side='right').astype(jnp.int32)       # [n_tiles]
    last_b = (jnp.searchsorted(starts, tile_ends, side='left') - 1).astype(jnp.int32)   # [n_tiles]

    grid_spec = pltpu.PrefetchScalarGridSpec(
        num_scalar_prefetch=3,
        grid=(core_splits, tiles_per_core),
        in_specs=[
            # packed [x|pos|ones] stream (double-buffered, contiguous HBM rows)
            pl.BlockSpec((tile_n, c_pack), lambda c, i, *_: (c * tiles_per_core + i, 0)),
            pl.BlockSpec((c_pack, hidden), lambda c, i, *_: (0, 0)),   # W1 (resident)
            pl.BlockSpec((hidden, c_pad), lambda c, i, *_: (0, 0)),    # W2 (resident)
            pl.BlockSpec((1, c_pad), lambda c, i, *_: (0, 0)),         # b2 (resident)
        ],
        # per-core partial accumulator slab, resident across the inner ("arbitrary") axis
        out_specs=pl.BlockSpec((None, b_pad, c_pad), lambda c, i, *_: (c, 0, 0)),
    )

    out_padded = pl.pallas_call(
        functools.partial(_global_sa_kernel, tile_n=tile_n,
                          tiles_per_core=tiles_per_core),
        out_shape=jax.ShapeDtypeStruct((core_splits, b_pad, c_pad), jnp.float32),
        grid_spec=grid_spec,
        compiler_params=pltpu.CompilerParams(
            dimension_semantics=("parallel", "arbitrary"),
            vmem_limit_bytes=vmem_limit_bytes),
    )(offsets, first_b, last_b, packed, w1_packed, w2p, b2p)

    # Combine per-core partial maxima (0 sentinel is exact: h >= 0) and strip padding.
    out = jnp.max(out_padded, axis=0)[:num_batches, :c_out]
    pos_out = jnp.zeros((num_batches, 3), dtype=pos.dtype)
    batch_out = jnp.arange(num_batches, dtype=jnp.int32)
    return out, pos_out, batch_out


def _reference(x, pos, batch, params, num_batches):
    """Plain-JAX reference for correctness checking."""
    w1, b1, w2, b2 = params
    xp = jnp.concatenate([x, pos], axis=1)
    h = jnp.maximum(xp @ w1 + b1, 0.0)
    h = jnp.maximum(h @ w2 + b2, 0.0)
    rows = []
    for b in range(num_batches):
        mask = (batch == b)[:, None]
        rows.append(jnp.max(jnp.where(mask, h, -jnp.inf), axis=0))
    return jnp.stack(rows, axis=0)


if __name__ == "__main__":
    # Small shapes: N=64 points, C_in=4 features, pos dim 3, MLP [7 -> 32 -> 64], B=2.
    N, C_IN, HIDDEN, C_OUT, B = 64, 4, 32, 64, 2

    key = jax.random.PRNGKey(0)
    k_x, k_pos, k_w1, k_b1, k_w2, k_b2 = jax.random.split(key, 6)

    x = jax.random.normal(k_x, (N, C_IN), dtype=jnp.float32)
    pos = jax.random.normal(k_pos, (N, 3), dtype=jnp.float32)
    # sorted batch ids (PyG convention): first half -> 0, second half -> 1
    batch = jnp.concatenate(
        [jnp.zeros((N // 2,), jnp.int32), jnp.ones((N - N // 2,), jnp.int32)])

    # Deterministic parameter init for self.nn = MLP([C_IN+3, HIDDEN, C_OUT]).
    params = (
        0.1 * jax.random.normal(k_w1, (C_IN + 3, HIDDEN), dtype=jnp.float32),
        0.1 * jax.random.normal(k_b1, (1, HIDDEN), dtype=jnp.float32),
        0.1 * jax.random.normal(k_w2, (HIDDEN, C_OUT), dtype=jnp.float32),
        0.1 * jax.random.normal(k_b2, (1, C_OUT), dtype=jnp.float32),
    )

    ref = _reference(x, pos, batch, params, B)

    # f32 path, single-core split (exact-ish; safe on all chip generations).
    out_x, out_pos, out_batch = global_sa_module(
        x, pos, batch, params, B, matmul_dtype=jnp.float32, core_splits=1)
    jax.block_until_ready((out_x, out_pos, out_batch))
    assert out_x.shape == (B, C_OUT)
    assert out_pos.shape == (B, 3)
    assert out_batch.shape == (B,)
    np.testing.assert_allclose(np.asarray(out_x), np.asarray(ref),
                               rtol=1e-5, atol=1e-5)
    np.testing.assert_allclose(np.asarray(out_pos), np.zeros((B, 3)), atol=0)
    np.testing.assert_array_equal(np.asarray(out_batch), np.arange(B))

    # Default bf16 matmul path + 2-way core split (v7x megacore layout); f32 accumulation.
    out_bf16, _, _ = global_sa_module(x, pos, batch, params, B, core_splits=2)
    jax.block_until_ready(out_bf16)
    np.testing.assert_allclose(np.asarray(out_bf16), np.asarray(ref),
                               rtol=5e-2, atol=5e-2)

    print("KERNEL_OK")
</pallas_src>

<mosaic_0001>
module attributes {stable_mosaic.version = 11 : i64} {
  func.func @_global_sa_kernel(%arg0: i32, %arg1: i32, %arg2: memref<3xi32, #tpu.memory_space<smem>>, %arg3: memref<1xi32, #tpu.memory_space<smem>>, %arg4: memref<1xi32, #tpu.memory_space<smem>>, %arg5: memref<128x8xf32, #tpu.memory_space<vmem>>, %arg6: memref<8x32xf32, #tpu.memory_space<vmem>>, %arg7: memref<32x128xf32, #tpu.memory_space<vmem>>, %arg8: memref<1x128xf32, #tpu.memory_space<vmem>>, %arg9: memref<1x8x128xf32, #tpu.memory_space<vmem>>) attributes {dimension_semantics = [#tpu.dimension_semantics<parallel>, #tpu.dimension_semantics<arbitrary>], iteration_bounds = array<i64: 1, 1>, scalar_prefetch = 3 : i64, scratch_operands = 0 : i64, tpu.core_type = #tpu.core_type<tc>, window_params = [{transform_indices = @transform_0, window_bounds = array<i64: 128, 8>}, {pipeline_mode = #tpu.pipeline_mode<synchronous>, transform_indices = @transform_1, window_bounds = array<i64: 8, 32>}, {pipeline_mode = #tpu.pipeline_mode<synchronous>, transform_indices = @transform_2, window_bounds = array<i64: 32, 128>}, {pipeline_mode = #tpu.pipeline_mode<synchronous>, transform_indices = @transform_3, window_bounds = array<i64: 1, 128>}, {transform_indices = @transform_4, window_bounds = array<i64: 1, 8, 128>}]} {
    %c1_i32 = arith.constant 1 : i32
    %0 = arith.muli %arg0, %c1_i32 : i32
    %1 = arith.addi %0, %arg1 : i32
    %c0_i32 = arith.constant 0 : i32
    %2 = arith.cmpi eq, %arg1, %c0_i32 : i32
    %3 = arith.extui %2 : i1 to i32
    %c0_i32_0 = arith.constant 0 : i32
    %4 = arith.cmpi ne, %3, %c0_i32_0 : i32
    scf.if %4 {
      %cst_20 = arith.constant 0.000000e+00 : f32
      %37 = vector.broadcast %cst_20 : f32 to vector<8x128xf32>
      %c0_21 = arith.constant 0 : index
      %c0_22 = arith.constant 0 : index
      %c0_23 = arith.constant 0 : index
      %38 = vector.load %arg9[%c0_21, %c0_22, %c0_23] : memref<1x8x128xf32, #tpu.memory_space<vmem>>, vector<1x8x128xf32>
      %39 = vector.shape_cast %38 : vector<1x8x128xf32> to vector<8x128xf32>
      %40 = vector.shape_cast %37 : vector<8x128xf32> to vector<1x8x128xf32>
      tpu.vector_store %arg9[%c0_21, %c0_22, %c0_23], %40 {strides = array<i32>} : memref<1x8x128xf32, #tpu.memory_space<vmem>>, vector<1x8x128xf32>,
    } else {
    }
    %c0 = arith.constant 0 : index
    %c0_1 = arith.constant 0 : index
    %5 = vector.load %arg5[%c0, %c0_1] : memref<128x8xf32, #tpu.memory_space<vmem>>, vector<128x8xf32>
    %c0_2 = arith.constant 0 : index
    %c0_3 = arith.constant 0 : index
    %6 = vector.load %arg6[%c0_2, %c0_3] : memref<8x32xf32, #tpu.memory_space<vmem>>, vector<8x32xf32>
    %cst = arith.constant dense<0.000000e+00> : vector<128x32xf32>
    %7 = tpu.matmul %5, %6, %cst {dimension_numbers = #tpu.dot_dimension_numbers<[1], [0], [0], [1], [0, 0, 1, 1], [], []>} : vector<128x8xf32>, vector<8x32xf32>, vector<128x32xf32> -> vector<128x32xf32>
    %cst_4 = arith.constant 0.000000e+00 : f32
    %8 = vector.broadcast %cst_4 : f32 to vector<128x32xf32>
    %9 = arith.maximumf %7, %8 : vector<128x32xf32>
    %c0_5 = arith.constant 0 : index
    %c0_6 = arith.constant 0 : index
    %10 = vector.load %arg7[%c0_5, %c0_6] : memref<32x128xf32, #tpu.memory_space<vmem>>, vector<32x128xf32>
    %cst_7 = arith.constant dense<0.000000e+00> : vector<128x128xf32>
    %11 = tpu.matmul %9, %10, %cst_7 {dimension_numbers = #tpu.dot_dimension_numbers<[1], [0], [0], [1], [0, 0, 1, 1], [], []>} : vector<128x32xf32>, vector<32x128xf32>, vector<128x128xf32> -> vector<128x128xf32>
    %c0_8 = arith.constant 0 : index
    %c0_9 = arith.constant 0 : index
    %12 = vector.load %arg8[%c0_8, %c0_9] : memref<1x128xf32, #tpu.memory_space<vmem>>, vector<1x128xf32>
    %13 = vector.broadcast %12 : vector<1x128xf32> to vector<128x128xf32>
    %14 = arith.addf %11, %13 : vector<128x128xf32>
    %cst_10 = arith.constant 0.000000e+00 : f32
    %15 = vector.broadcast %cst_10 : f32 to vector<128x128xf32>
    %16 = arith.maximumf %14, %15 : vector<128x128xf32>
    %c128_i32 = arith.constant 128 : i32
    %17 = arith.muli %1, %c128_i32 : i32
    %18 = tpu.iota {dimensions = array<i32: 0>} : vector<128x1xi32>
    %19 = vector.broadcast %17 : i32 to vector<128x1xi32>
    %20 = arith.addi %19, %18 : vector<128x1xi32>
    %21 = tpu.iota {dimensions = array<i32: 0>} : vector<8x1xi32>
    %22 = arith.index_cast %1 : i32 to index
    %23 = memref.load %arg3[%22] : memref<1xi32, #tpu.memory_space<smem>>
    %24 = arith.index_cast %1 : i32 to index
    %25 = memref.load %arg4[%24] : memref<1xi32, #tpu.memory_space<smem>>
    %c1_i32_11 = arith.constant 1 : i32
    %26 = arith.addi %25, %c1_i32_11 : i32
    %cst_12 = arith.constant 0.000000e+00 : f32
    %27 = vector.broadcast %cst_12 : f32 to vector<8x128xf32>
    %28 = arith.subi %26, %23 : i32
    %29 = arith.addi %23, %28 : i32
    %c1_i32_13 = arith.constant 1 : i32
    %30 = scf.for %arg10 = %23 to %29 step %c1_i32_13 iter_args(%arg11 = %27) -> (vector<8x128xf32>)  : i32 {
      %37 = arith.index_cast %arg10 : i32 to index
      %38 = memref.load %arg2[%37] : memref<3xi32, #tpu.memory_space<smem>>
      %c1_i32_20 = arith.constant 1 : i32
      %39 = arith.addi %arg10, %c1_i32_20 : i32
      %40 = arith.index_cast %39 : i32 to index
      %41 = memref.load %arg2[%40] : memref<3xi32, #tpu.memory_space<smem>>
      %42 = vector.broadcast %38 : i32 to vector<128x1xi32>
      %43 = arith.cmpi sge, %20, %42 : vector<128x1xi32>
      %44 = vector.broadcast %41 : i32 to vector<128x1xi32>
      %45 = arith.cmpi slt, %20, %44 : vector<128x1xi32>
      %46 = arith.andi %43, %45 : vector<128x1xi1>
      %cst_21 = arith.constant 0.000000e+00 : f32
      %47 = vector.shape_cast %46 : vector<128x1xi1> to vector<128x1xi1>
      %48 = vector.broadcast %47 : vector<128x1xi1> to vector<128x128xi1>
      %49 = vector.broadcast %cst_21 : f32 to vector<128x128xf32>
      %50 = arith.select %48, %16, %49 : vector<128x128xi1>, vector<128x128xf32>
      %cst_22 = arith.constant dense<0xFF800000> : vector<128xf32>
      %51 = vector.multi_reduction <maximumf>, %50, %cst_22 [0] : vector<128x128xf32> to vector<128xf32>
      %52 = vector.shape_cast %51 : vector<128xf32> to vector<1x128xf32>
      %53 = vector.broadcast %arg10 : i32 to vector<8x1xi32>
      %54 = arith.cmpi eq, %21, %53 : vector<8x1xi32>
      %55 = vector.broadcast %52 : vector<1x128xf32> to vector<8x128xf32>
      %56 = arith.maximumf %arg11, %55 : vector<8x128xf32>
      %57 = vector.shape_cast %54 : vector<8x1xi1> to vector<8x1xi1>
      %58 = vector.broadcast %57 : vector<8x1xi1> to vector<8x128xi1>
      %59 = arith.select %58, %56, %arg11 : vector<8x128xi1>, vector<8x128xf32>
      scf.yield %59 : vector<8x128xf32>
    }
    %c0_14 = arith.constant 0 : index
    %c0_15 = arith.constant 0 : index
    %c0_16 = arith.constant 0 : index
    %31 = vector.load %arg9[%c0_14, %c0_15, %c0_16] : memref<1x8x128xf32, #tpu.memory_space<vmem>>, vector<1x8x128xf32>
    %32 = vector.shape_cast %31 : vector<1x8x128xf32> to vector<8x128xf32>
    %33 = arith.maximumf %32, %30 : vector<8x128xf32>
    %c0_17 = arith.constant 0 : index
    %c0_18 = arith.constant 0 : index
    %c0_19 = arith.constant 0 : index
    %34 = vector.load %arg9[%c0_17, %c0_18, %c0_19] : memref<1x8x128xf32, #tpu.memory_space<vmem>>, vector<1x8x128xf32>
    %35 = vector.shape_cast %34 : vector<1x8x128xf32> to vector<8x128xf32>
    %36 = vector.shape_cast %33 : vector<8x128xf32> to vector<1x8x128xf32>
    tpu.vector_store %arg9[%c0_17, %c0_18, %c0_19], %36 {strides = array<i32>} : memref<1x8x128xf32, #tpu.memory_space<vmem>>, vector<1x8x128xf32>,
    return
  }
  func.func @transform_0(%arg0: i32, %arg1: i32, %arg2: memref<3xi32, #tpu.memory_space<smem>>, %arg3: memref<1xi32, #tpu.memory_space<smem>>, %arg4: memref<1xi32, #tpu.memory_space<smem>>) -> (i32, i32) {
    %c1_i32 = arith.constant 1 : i32
    %0 = arith.muli %arg0, %c1_i32 : i32
    %1 = arith.addi %0, %arg1 : i32
    %c0_i32 = arith.constant 0 : i32
    %c0_i32_0 = arith.constant 0 : i32
    return %1, %c0_i32 : i32, i32
  }
  func.func @transform_1(%arg0: i32, %arg1: i32, %arg2: memref<3xi32, #tpu.memory_space<smem>>, %arg3: memref<1xi32, #tpu.memory_space<smem>>, %arg4: memref<1xi32, #tpu.memory_space<smem>>) -> (i32, i32) {
    %c0_i32 = arith.constant 0 : i32
    %c0_i32_0 = arith.constant 0 : i32
    %c0_i32_1 = arith.constant 0 : i32
    return %c0_i32, %c0_i32_0 : i32, i32
  }
  func.func @transform_2(%arg0: i32, %arg1: i32, %arg2: memref<3xi32, #tpu.memory_space<smem>>, %arg3: memref<1xi32, #tpu.memory_space<smem>>, %arg4: memref<1xi32, #tpu.memory_space<smem>>) -> (i32, i32) {
    %c0_i32 = arith.constant 0 : i32
    %c0_i32_0 = arith.constant 0 : i32
    %c0_i32_1 = arith.constant 0 : i32
    return %c0_i32, %c0_i32_0 : i32, i32
  }
  func.func @transform_3(%arg0: i32, %arg1: i32, %arg2: memref<3xi32, #tpu.memory_space<smem>>, %arg3: memref<1xi32, #tpu.memory_space<smem>>, %arg4: memref<1xi32, #tpu.memory_space<smem>>) -> (i32, i32) {
    %c0_i32 = arith.constant 0 : i32
    %c0_i32_0 = arith.constant 0 : i32
    %c0_i32_1 = arith.constant 0 : i32
    return %c0_i32, %c0_i32_0 : i32, i32
  }
  func.func @transform_4(%arg0: i32, %arg1: i32, %arg2: memref<3xi32, #tpu.memory_space<smem>>, %arg3: memref<1xi32, #tpu.memory_space<smem>>, %arg4: memref<1xi32, #tpu.memory_space<smem>>) -> (i32, i32, i32) {
    %c0_i32 = arith.constant 0 : i32
    %c0_i32_0 = arith.constant 0 : i32
    %c0_i32_1 = arith.constant 0 : i32
    return %arg0, %c0_i32, %c0_i32_0 : i32, i32, i32
  }
}

</mosaic_0001>

<bundles_post_ra>
// kernel: tpu_custom_call.1
= control target key start
LH: loop header
LB: loop body
LE: loop exit
PB: predicated region body
PF: predicated region fallthrough
CT: control target
= control target key end

     0   :  { %s1355_s0 = inlined_call_operand.vmem [shape: s32[3], index: 0, kind: input, shape index: {}]   ;;  %s1356_s1 = inlined_call_operand.<no memory space> [shape: s32[1], index: 1, kind: input, shape index: {}]   ;;  %s1357_s2 = inlined_call_operand.<no memory space> [shape: s32[1], index: 2, kind: input, shape index: {}]   ;;  %s1358_s3 = inlined_call_operand.vmem [shape: f32[128,8], index: 3, kind: input, shape index: {}]   ;;  %s1359_s4 = inlined_call_operand.vmem [shape: f32[8,32], index: 4, kind: input, shape index: {}]   ;;  %s1360_s5 = inlined_call_operand.vmem [shape: f32[32,128], index: 5, kind: input, shape index: {}]   ;;  %s1361_s6 = inlined_call_operand.vmem [shape: f32[1,128], index: 6, kind: input, shape index: {}]   ;;  %s1362_s7 = inlined_call_operand.hbm [shape: f32[1,8,128], index: 7, kind: output, shape index: {}]  }
   0x1   :  { %s12_s26 = sshll.u32 %s1355_s0, 4  ;;  %s13_s26 = int_to_ptr.vmem [resolvable:$true] %s12_s26 }
   0x2   :  { %s864_s27 = scalar_lea.vmem %s13_s26, 16  ;;  %p869_p1 = scmp.lt.s32.totalorder %s13_s26, %s13_s26 }
   0x3   :  { %p865_p0 = scmp.ne.s32.totalorder %s13_s26, %s864_s27  ;;  %p870_p2 = scmp.lt.s32.totalorder %s864_s27, %s864_s27 }
   0x5   :  { %p871_p3 = por %p870_p2, %p869_p1 }
   0x7   :  { %p872_p4 = pnand %p871_p3, %p865_p0 }
   0x9   :  { %875 = shalt.err (!%p872_p4)  }
   0xa   :  { %s924_s28 = smov [#allocation3]  }
   0xb   :  { %15 = dma.vmem_to_smem %s13_s26, 16, %s924_s28, [#allocation2] }
   0xc   :  { %908 = dma.done.wait [#allocation2], 16 }
   0xd   :  { %909 = vsyncadd [#allocation2], 4294967280 }
   0xe   :  { %19 = sfence }
   0xf   :  { %20 = vsyncpa [#allocation7], 0  ;;  %v73_v0 = vld [vmem:[%s1359_s4] sm:$0xff]  ;;  %vm74_vm0 = vcmask 64512   ;;  %v925_v2 = vmov 0.0   ;;  %v58_v3 = vld [vmem:[%s1358_s3 + $0x8] sm:$0xff]  ;;  %v506_v54 = vlaneseq }
  0x10   :  { %v57_v1 = vld [vmem:[%s1358_s3] sm:$0xff]  ;;  %56 = vst [vmem:[#allocation6] sm:$0xff] %v925_v2  ;;  %779 = vmatprep.subr.mxu0 %v73_v0  ;;  %v59_v4 = vld [vmem:[%s1358_s3 + $0x10] sm:$0xff]  ;;  %v60_v5 = vld [vmem:[%s1358_s3 + $0x18] sm:$0xff]  ;;  %vm295_vm1 = vcmask 261120   ;;  %s542_s21 = sadd.s32 1, %s1357_s2 }
  0x11   :  { %781 = vmatprep.mubr.msk.f32.mxu0 %vm74_vm0, %v57_v1  ;;  %780 = vmatpush3.msra.mxu0 %v73_v0  ;;  %v61_v6 = vld [vmem:[%s1358_s3 + $0x20] sm:$0xff]  ;;  %v287_v7 = vld [vmem:[%s1360_s5 + $0x18] sm:$0xff]  ;;  %v62_v8 = vld [vmem:[%s1358_s3 + $0x28] sm:$0xff]  ;;  %v1065_v55 = vshrl.u32 %v506_v54, 7  ;;  %p702_p5 = scmp.ge.s32.totalorder %s1356_s1, %s542_s21 }
  0x12   :  { %782 = vmatmul.mubr.msk.f32.vlgmr.msra.gmra.mxu0 %vm74_vm0, %v58_v3  ;;  %805 = vmatprep.subr.mxu1 %v287_v7  ;;  %v63_v9 = vld [vmem:[%s1358_s3 + $0x30] sm:$0xff]  ;;  %v64_v10 = vld [vmem:[%s1358_s3 + $0x38] sm:$0xff]  ;;  %v65_v11 = vld [vmem:[%s1358_s3 + $0x40] sm:$0xff] }
  0x13   :  { %784 = vmatprep.mubr.msk.f32.mxu0 %vm74_vm0, %v59_v4  ;;  %806 = vmatpush3.msra.mxu1 %v287_v7  ;;  %v66_v12 = vld [vmem:[%s1358_s3 + $0x48] sm:$0xff]  ;;  %v67_v13 = vld [vmem:[%s1358_s3 + $0x50] sm:$0xff]  ;;  %v68_v14 = vld [vmem:[%s1358_s3 + $0x58] sm:$0xff]  ;;  %v1068_v56 = vadd.s32 8, %v1065_v55  ;;  %v1071_v57 = vadd.s32 16, %v1065_v55  ;;  %v1074_v58 = vadd.s32 24, %v1065_v55 }
  0x14   :  { %v69_v15 = vld [vmem:[%s1358_s3 + $0x60] sm:$0xff]  ;;  %v70_v16 = vld [vmem:[%s1358_s3 + $0x68] sm:$0xff]  ;;  %v71_v17 = vld [vmem:[%s1358_s3 + $0x70] sm:$0xff]  ;;  %v1077_v59 = vadd.s32 32, %v1065_v55  ;;  %v1083_v60 = vadd.s32 40, %v1065_v55  ;;  %v1086_v61 = vadd.s32 48, %v1065_v55 }
  0x15   :  { %v72_v18 = vld [vmem:[%s1358_s3 + $0x78] sm:$0xff]  ;;  %v286_v19 = vld [vmem:[%s1360_s5 + $0x10] sm:$0xff]  ;;  %v285_v20 = vld [vmem:[%s1360_s5 + $0x8] sm:$0xff]  ;;  %v1089_v62 = vadd.s32 56, %v1065_v55  ;;  %v1092_v63 = vadd.s32 64, %v1065_v55  ;;  %v1095_v0 = vadd.s32 72, %v1065_v55 }
  0x16   :  { %785 = vmatmul.mubr.msk.f32.gmra.mxu0 %vm74_vm0, %v60_v5  ;;  %807 = vmatprep.subr.mxu1 %v286_v19  ;;  %v284_v21 = vld [vmem:[%s1360_s5] sm:$0xff]  ;;  %v1098_v1 = vadd.s32 80, %v1065_v55  ;;  %v1101_v2 = vadd.s32 88, %v1065_v55  ;;  %v1104_v3 = vadd.s32 96, %v1065_v55  ;;  %v1107_v4 = vadd.s32 104, %v1065_v55 }
  0x17   :  { %787 = vmatprep.mubr.msk.f32.mxu0 %vm74_vm0, %v61_v6  ;;  %808 = vmatpush3.msra.mxu1 %v286_v19  ;;  %v1110_v5 = vadd.s32 112, %v1065_v55  ;;  %v1113_v6 = vadd.s32 120, %v1065_v55  ;;  %v725_v7 = vld [vmem:[%s1361_s6] ss:$0 sm:$0xff] }
  0x18   :  { %809 = vmatprep.subr.mxu1 %v285_v20 }
  0x19   :  { %810 = vmatpush3.msra.mxu1 %v285_v20 }
  0x1a   :  { %788 = vmatmul.mubr.msk.f32.gmra.mxu0 %vm74_vm0, %v62_v8  ;;  %811 = vmatprep.subr.mxu1 %v284_v21 }
  0x1b   :  { %790 = vmatprep.mubr.msk.f32.mxu0 %vm74_vm0, %v63_v9  ;;  %812 = vmatpush3.msra.mxu1 %v284_v21 }
  0x1e   :  { %791 = vmatmul.mubr.msk.f32.gmra.mxu0 %vm74_vm0, %v64_v10 }
  0x1f   :  { %793 = vmatprep.mubr.msk.f32.mxu0 %vm74_vm0, %v65_v11 }
  0x22   :  { %794 = vmatmul.mubr.msk.f32.gmra.mxu0 %vm74_vm0, %v66_v12 }
  0x23   :  { %796 = vmatprep.mubr.msk.f32.mxu0 %vm74_vm0, %v67_v13 }
  0x26   :  { %797 = vmatmul.mubr.msk.f32.gmra.mxu0 %vm74_vm0, %v68_v14 }
  0x27   :  { %799 = vmatprep.mubr.msk.f32.mxu0 %vm74_vm0, %v69_v15 }
  0x2a   :  { %800 = vmatmul.mubr.msk.f32.gmra.mxu0 %vm74_vm0, %v70_v16 }
  0x2b   :  { %802 = vmatprep.mubr.msk.f32.mxu0 %vm74_vm0, %v71_v17 }
  0x2e   :  { %803 = vmatmul.mubr.msk.f32.gmra.mxu0 %vm74_vm0, %v72_v18 }
  0xd2   :  { %v783_v22 = vpop.f32.mrf.mxu0 }
  0xd3   :  { %v269_v25 = vmax.f32 %v783_v22, 0.0 }
  0xd4   :  { %v189_v23 = vpop.f32.mrf.mxu0 }
  0xd5   :  { %v268_v24 = vmax.f32 %v189_v23, 0.0 }
  0xd6   :  { %v786_v26 = vpop.f32.mrf.mxu0 }
  0xd7   :  { %813 = vmatprep.mubr.msk.f32.mxu1 %vm295_vm1, %v268_v24  ;;  %v271_v29 = vmax.f32 %v786_v26, 0.0 }
  0xd8   :  { %v199_v27 = vpop.f32.mrf.mxu0  ;;  %814 = vmatmul.mubr.msk.f32.vlgmr.msra.gmra.mxu1 %vm295_vm1, %v269_v25 }
  0xd9   :  { %v270_v28 = vmax.f32 %v199_v27, 0.0 }
  0xda   :  { %v789_v30 = vpop.f32.mrf.mxu0 }
  0xdb   :  { %816 = vmatprep.mubr.msk.f32.mxu1 %vm295_vm1, %v270_v28  ;;  %v273_v33 = vmax.f32 %v789_v30, 0.0 }
  0xdc   :  { %v209_v31 = vpop.f32.mrf.mxu0  ;;  %817 = vmatmul.mubr.msk.f32.gmra.mxu1 %vm295_vm1, %v271_v29 }
  0xdd   :  { %v272_v32 = vmax.f32 %v209_v31, 0.0 }
  0xde   :  { %v792_v34 = vpop.f32.mrf.mxu0 }
  0xdf   :  { %819 = vmatprep.mubr.msk.f32.mxu1 %vm295_vm1, %v272_v32  ;;  %v275_v37 = vmax.f32 %v792_v34, 0.0 }
  0xe0   :  { %v219_v35 = vpop.f32.mrf.mxu0  ;;  %820 = vmatmul.mubr.msk.f32.gmra.mxu1 %vm295_vm1, %v273_v33 }
  0xe1   :  { %v274_v36 = vmax.f32 %v219_v35, 0.0 }
  0xe2   :  { %v795_v38 = vpop.f32.mrf.mxu0 }
  0xe3   :  { %822 = vmatprep.mubr.msk.f32.mxu1 %vm295_vm1, %v274_v36  ;;  %v277_v41 = vmax.f32 %v795_v38, 0.0 }
  0xe4   :  { %v229_v39 = vpop.f32.mrf.mxu0  ;;  %823 = vmatmul.mubr.msk.f32.gmra.mxu1 %vm295_vm1, %v275_v37 }
  0xe5   :  { %v276_v40 = vmax.f32 %v229_v39, 0.0 }
  0xe6   :  { %v798_v42 = vpop.f32.mrf.mxu0 }
  0xe7   :  { %825 = vmatprep.mubr.msk.f32.mxu1 %vm295_vm1, %v276_v40  ;;  %v279_v45 = vmax.f32 %v798_v42, 0.0 }
  0xe8   :  { %v239_v43 = vpop.f32.mrf.mxu0  ;;  %826 = vmatmul.mubr.msk.f32.gmra.mxu1 %vm295_vm1, %v277_v41 }
  0xe9   :  { %v278_v44 = vmax.f32 %v239_v43, 0.0 }
  0xea   :  { %v801_v46 = vpop.f32.mrf.mxu0 }
  0xeb   :  { %828 = vmatprep.mubr.msk.f32.mxu1 %vm295_vm1, %v278_v44  ;;  %v281_v49 = vmax.f32 %v801_v46, 0.0 }
  0xec   :  { %v249_v47 = vpop.f32.mrf.mxu0  ;;  %829 = vmatmul.mubr.msk.f32.gmra.mxu1 %vm295_vm1, %v279_v45 }
  0xed   :  { %v280_v48 = vmax.f32 %v249_v47, 0.0 }
  0xee   :  { %v804_v50 = vpop.f32.mrf.mxu0 }
  0xef   :  { %831 = vmatprep.mubr.msk.f32.mxu1 %vm295_vm1, %v280_v48  ;;  %v283_v53 = vmax.f32 %v804_v50, 0.0 }
  0xf0   :  { %v259_v51 = vpop.f32.mrf.mxu0  ;;  %832 = vmatmul.mubr.msk.f32.gmra.mxu1 %vm295_vm1, %v281_v49 }
  0xf1   :  { %v282_v52 = vmax.f32 %v259_v51, 0.0 }
  0xf3   :  { %834 = vmatprep.mubr.msk.f32.mxu1 %vm295_vm1, %v282_v52 }
  0xf4   :  { %835 = vmatmul.mubr.msk.f32.gmra.mxu1 %vm295_vm1, %v283_v53 }
 0x198   :  { %v815_v8 = vpop.f32.mrf.mxu1 }
 0x199   :  { %v1118_v9 = vadd.f32 %v815_v8, %v725_v7 }
 0x19a   :  { %v410_v10 = vpop.f32.mrf.mxu1 }
 0x19b   :  { %v1121_v12 = vadd.f32 %v725_v7, %v410_v10  ;;  %v1173_v10 = vmov 0.0  }
 0x19c   :  { %v818_v13 = vpop.f32.mrf.mxu1 }
 0x19d   :  { %v1124_v15 = vadd.f32 %v818_v13, %v725_v7 }
 0x19e   :  { %v420_v16 = vpop.f32.mrf.mxu1 }
 0x19f   :  { %v1127_v18 = vadd.f32 %v725_v7, %v420_v16 }
 0x1a0   :  { %v821_v19 = vpop.f32.mrf.mxu1 }
 0x1a1   :  { %v1130_v21 = vadd.f32 %v821_v19, %v725_v7 }
 0x1a2   :  { %v430_v22 = vpop.f32.mrf.mxu1 }
 0x1a3   :  { %v1133_v24 = vadd.f32 %v725_v7, %v430_v22 }
 0x1a4   :  { %v824_v25 = vpop.f32.mrf.mxu1 }
 0x1a5   :  { %v1136_v27 = vadd.f32 %v824_v25, %v725_v7 }
 0x1a6   :  { %v440_v28 = vpop.f32.mrf.mxu1 }
 0x1a7   :  { %v496_v29 = vmax.f32 %v1136_v27, 0.0  ;;  %v1139_v30 = vadd.f32 %v725_v7, %v440_v28 }
 0x1a8   :  { %v827_v31 = vpop.f32.mrf.mxu1 }
 0x1a9   :  { %v495_v32 = vmax.f32 %v1139_v30, 0.0  ;;  %v1142_v33 = vadd.f32 %v827_v31, %v725_v7 }
 0x1aa   :  { %v450_v34 = vpop.f32.mrf.mxu1 }
 0x1ab   :  { %v498_v35 = vmax.f32 %v1142_v33, 0.0  ;;  %v1145_v36 = vadd.f32 %v725_v7, %v450_v34 }
 0x1ac   :  { %v830_v37 = vpop.f32.mrf.mxu1 }
 0x1ad   :  { %v497_v38 = vmax.f32 %v1145_v36, 0.0  ;;  %v1148_v39 = vadd.f32 %v830_v37, %v725_v7 }
 0x1ae   :  { %v460_v40 = vpop.f32.mrf.mxu1 }
 0x1af   :  { %v500_v41 = vmax.f32 %v1148_v39, 0.0  ;;  %v1151_v42 = vadd.f32 %v725_v7, %v460_v40 }
 0x1b0   :  { %v833_v43 = vpop.f32.mrf.mxu1 }
 0x1b1   :  { %v499_v44 = vmax.f32 %v1151_v42, 0.0  ;;  %v1154_v45 = vadd.f32 %v833_v43, %v725_v7 }
 0x1b2   :  { %v470_v46 = vpop.f32.mrf.mxu1 }
 0x1b3   :  { %v502_v47 = vmax.f32 %v1154_v45, 0.0  ;;  %v1157_v48 = vadd.f32 %v725_v7, %v470_v46 }
 0x1b4   :  { %v836_v49 = vpop.f32.mrf.mxu1 }
 0x1b5   :  { %v501_v50 = vmax.f32 %v1157_v48, 0.0  ;;  %v1160_v51 = vadd.f32 %v836_v49, %v725_v7  ;;  %704 = sbr.rel (%p702_p5) target bundleno = 491 (0x1eb), region = 44 }
 0x1b6   :  { %v480_v52 = vpop.f32.mrf.mxu1 }
 0x1b7   :  { %v504_v53 = vmax.f32 %v1160_v51, 0.0  ;;  %v1163_v54 = vadd.f32 %v725_v7, %v480_v52 }
 0x1b9   :  { %v503_v8 = vmax.f32 %v1163_v54, 0.0 }
 0x1ba   :  { %v1175_v13 = vmov 0.0  }
 0x1bb LB: > { %s550_s29 = sld [smem:[#allocation3 + %s918_s1]]  ;;  %s1190_s30 = sadd.s32 1, %s918_s1   ;;  %v1363_v14 = vmax.f32 %v1121_v12, 0.0  ;;  %v1364_v11 = vmax.f32 %v1118_v9, 0.0  ;;  %v1365_v20 = vmax.f32 %v1127_v18, 0.0  ;;  %v1366_v26 = vmax.f32 %v1133_v24, 0.0  ;;  %s918_s1 = sphi %s1356_s1, %s1371_s1   ;;  %v914_v13 = vphi %v1175_v13, %v1370_v13  }
 0x1bc   : > { %s552_s8 = sld [smem:[#allocation3 + %s1190_s30]]  ;;  %v1368_v17 = vmax.f32 %v1124_v15, 0.0  ;;  %v1369_v23 = vmax.f32 %v1130_v21, 0.0  ;;  %p545_p6 = scmp.ge.s32.totalorder %s1190_s30, %s542_s21 }
 0x1c1   : > { %v1193_v7 = vstv %s550_s29 }
 0x1c2   : > { %vm554_vm2 = vcmp.ge.s32.totalorder %v1065_v55, %v1193_v7  ;;  %vm555_vm3 = vcmp.ge.s32.totalorder %v1068_v56, %v1193_v7  ;;  %v1199_v16 = vstv %s552_s8  ;;  %vm556_vm4 = vcmp.ge.s32.totalorder %v1071_v57, %v1193_v7 }
 0x1c3   : > { %vm571_vm5 = vcmp.lt.s32.totalorder %v1065_v55, %v1199_v16  ;;  %vm572_vm6 = vcmp.lt.s32.totalorder %v1068_v56, %v1199_v16  ;;  %vm573_vm7 = vcmp.lt.s32.totalorder %v1071_v57, %v1199_v16  ;;  %vm557_vm8 = vcmp.ge.s32.totalorder %v1074_v58, %v1193_v7 }
 0x1c4   : > { %vm574_vm9 = vcmp.lt.s32.totalorder %v1074_v58, %v1199_v16  ;;  %vm587_vm10 = vmand %vm554_vm2, %vm571_vm5  ;;  %vm558_vm11 = vcmp.ge.s32.totalorder %v1077_v59, %v1193_v7  ;;  %vm575_vm12 = vcmp.lt.s32.totalorder %v1077_v59, %v1199_v16  ;;  %vm559_vm14 = vcmp.ge.s32.totalorder %v1083_v60, %v1193_v7 }
 0x1c5   : > { %vm588_vm13 = vmand %vm555_vm3, %vm572_vm6  ;;  %vm576_vm15 = vcmp.lt.s32.totalorder %v1083_v60, %v1199_v16  ;;  %vm577_vm2 = vcmp.lt.s32.totalorder %v1086_v61, %v1199_v16  ;;  %v635_v19 = vsel %vm587_vm10, %v1363_v14, 0.0  ;;  %vm561_vm3 = vcmp.ge.s32.totalorder %v1089_v62, %v1193_v7 }
 0x1c6   : > { %vm589_vm0 = vmand %vm556_vm4, %vm573_vm7  ;;  %vm562_vm6 = vcmp.ge.s32.totalorder %v1092_v63, %v1193_v7  ;;  %vm578_vm4 = vcmp.lt.s32.totalorder %v1089_v62, %v1199_v16  ;;  %v636_v22 = vsel %vm588_vm13, %v1364_v11, 0.0  ;;  %vm563_vm1 = vcmp.ge.s32.totalorder %v1095_v0, %v1193_v7 }
 0x1c7   : > { %vm590_vm5 = vmand %vm557_vm8, %vm574_vm9  ;;  %vm579_vm8 = vcmp.lt.s32.totalorder %v1092_v63, %v1199_v16  ;;  %v637_v25 = vsel %vm589_vm0, %v1365_v20, 0.0  ;;  %vm580_vm10 = vcmp.lt.s32.totalorder %v1095_v0, %v1199_v16  ;;  %vm564_vm13 = vcmp.ge.s32.totalorder %v1098_v1, %v1193_v7 }
 0x1c8   : > { %vm591_vm7 = vmand %vm558_vm11, %vm575_vm12  ;;  %vm1367_vm11 = vcmp.ge.s32.totalorder %v1086_v61, %v1193_v7  ;;  %v638_v31 = vsel %vm590_vm5, %v1368_v17, 0.0  ;;  %vm565_vm0 = vcmp.ge.s32.totalorder %v1101_v2, %v1193_v7 }
 0x1c9   : > { %vm592_vm9 = vmand %vm559_vm14, %vm576_vm15  ;;  %v639_v28 = vsel %vm591_vm7, %v1366_v26, 0.0  ;;  %vm581_vm14 = vcmp.lt.s32.totalorder %v1098_v1, %v1199_v16  ;;  %v672_v26 = vstv %s918_s1  ;;  %s1371_s1 = smov %s1190_s30 }
 0x1ca   : > { %vm593_vm12 = vmand %vm1367_vm11, %vm577_vm2  ;;  %v640_v34 = vsel %vm592_vm9, %v1369_v23, 0.0  ;;  %v651_v37 = vmax.f32 %v635_v19, %v639_v28  ;;  %vm582_vm2 = vcmp.lt.s32.totalorder %v1101_v2, %v1199_v16 }
 0x1cb   : > { %vm594_vm15 = vmand %vm561_vm3, %vm578_vm4  ;;  %v641_v40 = vsel %vm593_vm12, %v495_v32, 0.0  ;;  %v652_v43 = vmax.f32 %v636_v22, %v640_v34  ;;  %vm566_vm3 = vcmp.ge.s32.totalorder %v1104_v3, %v1193_v7  ;;  %vm583_vm4 = vcmp.lt.s32.totalorder %v1104_v3, %v1199_v16 }
 0x1cc   : > { %vm595_vm5 = vmand %vm562_vm6, %vm579_vm8  ;;  %v642_v46 = vsel %vm594_vm15, %v496_v29, 0.0  ;;  %v653_v49 = vmax.f32 %v637_v25, %v641_v40  ;;  %vm567_vm6 = vcmp.ge.s32.totalorder %v1107_v4, %v1193_v7  ;;  %vm584_vm8 = vcmp.lt.s32.totalorder %v1107_v4, %v1199_v16 }
 0x1cd   : > { %vm596_vm7 = vmand %vm563_vm1, %vm580_vm10  ;;  %v643_v52 = vsel %vm595_vm5, %v497_v38, 0.0  ;;  %v654_v10 = vmax.f32 %v638_v31, %v642_v46  ;;  %vm568_vm1 = vcmp.ge.s32.totalorder %v1110_v5, %v1193_v7  ;;  %vm585_vm10 = vcmp.lt.s32.totalorder %v1110_v5, %v1199_v16 }
 0x1ce   : > { %vm597_vm9 = vmand %vm564_vm13, %vm581_vm14  ;;  %v644_v19 = vsel %vm596_vm7, %v498_v35, 0.0  ;;  %v655_v22 = vmax.f32 %v651_v37, %v643_v52  ;;  %vm569_vm12 = vcmp.ge.s32.totalorder %v1113_v6, %v1193_v7  ;;  %vm586_vm13 = vcmp.lt.s32.totalorder %v1113_v6, %v1199_v16 }
 0x1cf   : > { %vm598_vm11 = vmand %vm565_vm0, %vm582_vm2  ;;  %v645_v25 = vsel %vm597_vm9, %v499_v44, 0.0  ;;  %v656_v28 = vmax.f32 %v652_v43, %v644_v19  ;;  %vm673_vm5 = vcmp.eq.s32.totalorder %v1065_v55, %v672_v26 }
 0x1d0   : > { %vm599_vm14 = vmand %vm566_vm3, %vm583_vm4  ;;  %v646_v31 = vsel %vm598_vm11, %v500_v41, 0.0  ;;  %v657_v34 = vmax.f32 %v653_v49, %v645_v25 }
 0x1d1   : > { %vm600_vm15 = vmand %vm567_vm6, %vm584_vm8  ;;  %v647_v37 = vsel %vm599_vm14, %v501_v50, 0.0  ;;  %v658_v40 = vmax.f32 %v654_v10, %v646_v31 }
 0x1d2   : > { %vm601_vm0 = vmand %vm568_vm1, %vm585_vm10  ;;  %v648_v16 = vsel %vm600_vm15, %v502_v47, 0.0  ;;  %v659_v43 = vmax.f32 %v655_v22, %v647_v37 }
 0x1d3   : > { %vm602_vm2 = vmand %vm569_vm12, %vm586_vm13  ;;  %v649_v46 = vsel %vm601_vm0, %v503_v8, 0.0  ;;  %v660_v52 = vmax.f32 %v656_v28, %v648_v16 }
 0x1d4   : > { %v650_v49 = vsel %vm602_vm2, %v504_v53, 0.0  ;;  %v661_v7 = vmax.f32 %v657_v34, %v649_v46 }
 0x1d5   : > { %v662_v19 = vmax.f32 %v658_v40, %v650_v49  ;;  %v663_v25 = vmax.f32 %v659_v43, %v660_v52 }
 0x1d7   : > { %v664_v11 = vmax.f32 %v661_v7, %v662_v19 }
 0x1d9   : > { %v665_v14 = vmax.f32 %v663_v25, %v664_v11 }
 0x1db   : > { %v666_v10 = vrot.slane %v665_v14, 4 }
 0x1dd   : > { %v667_v31 = vmax.f32 %v665_v14, %v666_v10 }
 0x1df   : > { %v668_v17 = vrot.slane %v667_v31, 2 }
 0x1e1   : > { %v669_v20 = vmax.f32 %v667_v31, %v668_v17 }
 0x1e3   : > { %v670_v23 = vrot.slane %v669_v20, 1 }
 0x1e5   : > { %v671_v22 = vmax.f32 %v669_v20, %v670_v23 }
 0x1e6   :  { %548 = sbr.rel (!%p545_p6) target bundleno = 443 (0x1bb), region = 50 }
 0x1e7   : > { %v674_v37 = vmax.f32 %v914_v13, %v671_v22 }
 0x1e9   : > { %v677_v28 = vsel %vm673_vm5, %v674_v37, %v914_v13  }
 0x1ea   : > { %v1370_v13 = vmov %v677_v28  ;;  %v1372_v10 = vmov (%p545_p6), %v677_v28 }
 0x1eb PF:  { %v678_v11 = vld [vmem:[#allocation6] sm:$0xff]  ;;  %s926_s1 = smov [#allocation6]   ;;  %v922_v10 = vphi %v1173_v10, %v1372_v10  }
 0x1ec   :  { %v679_v14 = vmax.f32 %v678_v11, %v922_v10  ;;  %s687_s10 = sshll.u32 %s926_s1, 4  ;;  %s688_s10 = int_to_ptr.vmem [resolvable:$true] %s687_s10 }
 0x1ed   :  { %s876_s11 = scalar_lea.vmem %s688_s10, 128  ;;  %p881_p8 = scmp.lt.s32.totalorder %s688_s10, %s688_s10 }
 0x1ee   :  { %680 = vst [vmem:[#allocation6] sm:$0xff] %v679_v14  ;;  %p877_p7 = scmp.ne.s32.totalorder %s688_s10, %s876_s11  ;;  %p882_p9 = scmp.lt.s32.totalorder %s876_s11, %s876_s11 }
 0x1f0   :  { %p883_p10 = por %p882_p9, %p881_p8 }
 0x1f2   :  { %p884_p11 = pnand %p883_p10, %p877_p7 }
 0x1f4   :  { %887 = shalt.err (!%p884_p11)
}
 0x1f5   :  { %690 = dma.vmem_to_hbm [thread:$0]  %s688_s10, 128, %s1362_s7, [#allocation7]  }
 0x1f6   :  { %910 = dma.done.wait [#allocation7], 128  }
 0x1f7   :  { %911 = vsyncadd [#allocation7], 4294967168 }
 0x1f8   :  { %694 = vsyncpa [#allocation7], 1 }

</bundles_post_ra>
